<compile_context>
chip_gen: v7x
topology: tpu7x:2x2x1
jax: 0.10.0
libtpu: 0.0.40
codegen_flags: <defaults>
</compile_context>

<pallas_src>
import functools

import jax
import jax.numpy as jnp
from jax.experimental import pallas as pl
from jax.experimental.pallas import tpu as pltpu

_LANES = 128
_SUBLANES = 8


def _round_up(x, m):
    return ((x + m - 1) // m) * m


def _chip_config():
    """Best-effort chip query -> (#tensorcores, scoped VMEM limit, input budget)."""
    cores, vmem_cap = 1, None
    try:
        info = pltpu.get_tpu_info()
    except Exception:
        info = None
    if info is not None:
        vmem_cap = getattr(info, "vmem_capacity_bytes", None)
        for name in ("num_cores", "core_count", "num_tensorcores",
                     "tensorcores_per_chip"):
            v = getattr(info, name, None)
            if isinstance(v, int) and v == 2:
                cores = 2
                break
    if isinstance(vmem_cap, int) and vmem_cap >= 100 * (1 << 20):
        # v5e / v6e (128 MiB physical VMEM): roomier scoped limit and tiles.
        return cores, 64 * (1 << 20), 24 * (1 << 20)
    # v7x (64 MiB physical) or unknown chip: conservative settings fit everywhere.
    return cores, 32 * (1 << 20), 12 * (1 << 20)


_NUM_CORES, _VMEM_LIMIT, _INPUT_VMEM_BUDGET = _chip_config()


def _softplus(x):
    # torch.nn.Softplus(beta=1, threshold=20).  log(1+exp) (not log1p) to stay in
    # the guaranteed Mosaic elementwise set; shared by kernel and reference.
    return jnp.where(x > 20.0, x, jnp.log(1.0 + jnp.exp(jnp.minimum(x, 20.0))))


# --------------------------------------------------------------------------
# Pass 1: fused lane-dense sum reductions
# --------------------------------------------------------------------------
def _pair_sum_quants(n_pairs, n_sums):
    """For each leading (a, b) pair -> [|a-b|, (a-b)^2]; then raw values to sum."""
    def fn(blocks):
        out = []
        k = 0
        for _ in range(n_pairs):
            d = blocks[k] - blocks[k + 1]
            out.append(jnp.abs(d))
            out.append(d * d)
            k += 2
        for j in range(n_sums):
            out.append(blocks[k + j])
        return out
    return fn


def _make_reduce_kernel(n_in, nq, quant_fn, total, needs_mask):
    """Lane-dense (block_rows, 128) inputs -> nq resident (8,128) accumulators."""
    def kernel(*refs):
        in_refs = refs[:n_in]
        out_ref = refs[n_in]
        c = pl.program_id(0)
        step = pl.program_id(1)
        steps = pl.num_programs(1)

        @pl.when(step == 0)
        def _init():
            out_ref[...] = jnp.zeros_like(out_ref)

        blocks = [r[...].astype(jnp.float32) for r in in_refs]
        br = blocks[0].shape[0]

        quants = quant_fn(blocks)
        assert len(quants) == nq

        if needs_mask:
            # Logical element index of every element of this block (ragged tail /
            # clamped edge blocks are masked instead of padding inputs in HBM).
            row0 = (c * steps + step) * br
            rid = jax.lax.broadcasted_iota(jnp.int32, (br, _LANES), 0) + row0
            lid = jax.lax.broadcasted_iota(jnp.int32, (br, _LANES), 1)
            valid = (rid * _LANES + lid) < total
            quants = [jnp.where(valid, q, 0.0) for q in quants]

        for qi, q in enumerate(quants):
            # VPU-only fold of the (br,128) tile onto the (8,128) accumulator.
            out_ref[0, qi] += q.reshape(-1, _SUBLANES, _LANES).sum(axis=0)
    return kernel


def _lane_dense_reduce(arrays, quant_fn, nq):
    """Global sums of per-element quantities over equally-sized arrays."""
    total = int(arrays[0].size)
    n_in = len(arrays)

    padded_total = _round_up(total, _LANES)
    rows = padded_total // _LANES

    def _prep(x):
        flat = x.reshape(-1)
        if padded_total != total:
            # TODO(synk): minimal pad only when size % 128 != 0 (reshape needs it);
            # correctness is guaranteed by the in-kernel mask, not the pad value.
            flat = jnp.pad(flat, (0, padded_total - total))
        return flat.reshape(rows, _LANES)

    inputs = [_prep(x) for x in arrays]

    ncores = _NUM_CORES if rows >= 2 * _SUBLANES else 1
    # Size blocks against the full footprint: inputs x 2 buffers + nq temporaries.
    bytes_per_row = (2 * n_in + nq + 2) * _LANES * 4
    cap_rows = max(_SUBLANES,
                   (_INPUT_VMEM_BUDGET // bytes_per_row) // _SUBLANES * _SUBLANES)
    block_rows = min(cap_rows, _round_up(pl.cdiv(rows, ncores), _SUBLANES))
    steps = pl.cdiv(rows, ncores * block_rows)
    n_blocks = pl.cdiv(rows, block_rows)
    needs_mask = (padded_total != total) or (ncores * steps * block_rows != rows)

    def in_map(c, i, s=steps, nb=n_blocks):
        # Clamp so a core never issues a fully out-of-bounds DMA; duplicated data
        # from clamped blocks is masked in-kernel via the logical element index.
        return (jnp.minimum(c * s + i, nb - 1), 0)

    sem0 = pltpu.CORE_PARALLEL if ncores > 1 else pltpu.ARBITRARY
    partials = pl.pallas_call(
        _make_reduce_kernel(n_in, nq, quant_fn, total, needs_mask),
        out_shape=jax.ShapeDtypeStruct((ncores, nq, _SUBLANES, _LANES), jnp.float32),
        grid_spec=pltpu.PrefetchScalarGridSpec(
            num_scalar_prefetch=0,
            grid=(ncores, steps),
            in_specs=[pl.BlockSpec((block_rows, _LANES), in_map)] * n_in,
            out_specs=pl.BlockSpec((1, nq, _SUBLANES, _LANES),
                                   lambda c, i: (c, 0, 0, 0)),
        ),
        compiler_params=pltpu.CompilerParams(
            dimension_semantics=(sem0, pltpu.ARBITRARY),
            vmem_limit_bytes=_VMEM_LIMIT),
    )(*inputs)
    return partials.sum(axis=(0, 2, 3))   # (nq,) global sums


# --------------------------------------------------------------------------
# Pass 2: lane-dense regularization kernel (list path [phase, attenuation]):
#   r = softplus(-phase) / softplus(attenuation)
#   -> [ TV_power1(r), TV_power2(r), entropy(phase) + entropy(attenuation) ]
# Images are viewed as (n*c, h*w) so the lane axis is fully used; neighbour
# differences use pltpu.roll on the lane axis + boundary masks.
# --------------------------------------------------------------------------
def _reg_kernel(inv_ref, dwk_ref, ph_ref, at_ref, out_ref, *,
                eps, h, w, hw, nc, nc_tile, needs_row_mask, needs_ent_mask):
    cc = pl.program_id(0)
    t = pl.program_id(1)
    steps = pl.num_programs(1)

    @pl.when(t == 0)
    def _init():
        out_ref[...] = jnp.zeros_like(out_ref)

    ph = ph_ref[...].astype(jnp.float32)          # (nc_tile, hw_p)
    at = at_ref[...].astype(jnp.float32)
    hw_p = ph.shape[1]

    eid = jax.lax.broadcasted_iota(jnp.int32, (nc_tile, hw_p), 1)
    row_valid = None
    if needs_row_mask:
        rid = (jax.lax.broadcasted_iota(jnp.int32, (nc_tile, hw_p), 0)
               + (cc * steps + t) * nc_tile)
        row_valid = rid < nc

    # Exact divide (approx reciprocal biased the TV terms).
    r = _softplus(-ph) / _softplus(at)
    if needs_row_mask:
        r = jnp.where(row_valid, r, 0.0)          # masked rows contribute 0

    # Neighbour along W (flat index e -> e+1) and along H (e -> e+w) via XLU rolls.
    r_w = pltpu.roll(r, shift=hw_p - 1, axis=1)   # r_w[:, e] = r[:, (e+1) % hw_p]
    r_h = pltpu.roll(r, shift=hw_p - w, axis=1)   # r_h[:, e] = r[:, (e+w) % hw_p]
    dwk = dwk_ref[...]                            # (1, hw_p) 0/1: e%w<w-1 and e+1<hw
    dw = (r_w - r) * dwk
    dh = jnp.where(eid < (h - 1) * w, r_h - r, 0.0)

    # Shannon-entropy terms; 1/(sum+eps) normalizers hoisted to the wrapper (SMEM).
    p_ph = jnp.clip(ph * inv_ref[0], eps, 1.0 - eps)
    p_at = jnp.clip(at * inv_ref[1], eps, 1.0 - eps)
    ent = -(p_ph * jnp.log(p_ph)) - (p_at * jnp.log(p_at))
    if needs_ent_mask:
        ent_valid = eid < hw
        if needs_row_mask:
            ent_valid = ent_valid & row_valid
        ent = jnp.where(ent_valid, ent, 0.0)

    def fold(q):
        # (nc_tile, hw_p) -> (8, 128) via layout-preserving reshape + vreg adds.
        q4 = q.reshape(nc_tile // _SUBLANES, _SUBLANES, hw_p // _LANES, _LANES)
        return q4.sum(axis=2).sum(axis=0)

    out_ref[0, 0] += fold(jnp.abs(dh) + jnp.abs(dw))
    out_ref[0, 1] += fold(dh * dh + dw * dw)
    out_ref[0, 2] += fold(ent)


class GeneratorLossPallas:
    """Pallas-TPU port of GeneratorLoss.forward (default-style configuration)."""

    def __init__(self, output_num=2, **kwargs):
        self.output_num = output_num
        self.l1_ratio = kwargs.get("l1_ratio", 1.0)
        self.l2_ratio = kwargs.get("l2_ratio", 0.0)
        self.fourier_ratio = kwargs.get("fourier_ratio", 0.0)
        self.reg_l1_ratio = kwargs.get("reg_l1_ratio", 0.0)
        self.reg_l2_ratio = kwargs.get("reg_l2_ratio", 0.0)
        self.vgg_loss_ratio = kwargs.get("vgg_loss_ratio", 0.0)
        self.ssim_loss_weight = kwargs.get("ssim_loss_weight", 0.0)
        self.psnr_loss_weight = kwargs.get("psnr_loss_weight", 0.0)
        self.reg_entropy_loss = kwargs.get("reg_entropy_loss", 0.0)
        if (self.ssim_loss_weight or self.psnr_loss_weight
                or self.fourier_ratio or self.vgg_loss_ratio):
            # TODO(synk): SSIM / PSNR / FFT / pretrained-VGG perceptual terms have
            # no clean Pallas equivalent here; not implemented.
            raise NotImplementedError("ssim/psnr/fourier/vgg terms not supported")

    # -------------------- regularization (list path) --------------------
    def _regularization_list(self, phase, attenuation, ph_at_sums, eps=1e-8):
        n, c, h, w = phase.shape
        nc, hw = n * c, h * w
        hw_p = _round_up(hw, _LANES)

        ph2 = phase.reshape(nc, hw)
        at2 = attenuation.reshape(nc, hw)
        if hw_p != hw:
            # TODO(synk): lane-pad copy only when h*w % 128 != 0; pad values are
            # excluded by the in-kernel masks.
            ph2 = jnp.pad(ph2, ((0, 0), (0, hw_p - hw)))
            at2 = jnp.pad(at2, ((0, 0), (0, hw_p - hw)))

        # Precomputed dw neighbour-keep mask (avoids vector int mod in-kernel).
        e = jnp.arange(hw_p, dtype=jnp.int32)
        dw_keep = (((e % w) < (w - 1)) & (e < hw)).astype(jnp.float32)[None, :]

        # Hoisted entropy normalizers (one scalar divide in XLA, SMEM input below).
        inv_sums = 1.0 / (ph_at_sums.astype(jnp.float32) + eps)

        # nc_tile sized against the full footprint: 2 inputs x 2 buffers + ~10 live
        # f32 temporaries of (nc_tile, hw_p).
        # TODO(synk): for very large h*w the image row itself should be tiled.
        bytes_per_img_row = 14 * hw_p * 4
        nc_tile = max(_SUBLANES,
                      (_INPUT_VMEM_BUDGET // bytes_per_img_row)
                      // _SUBLANES * _SUBLANES)
        nc_tile = min(nc_tile, _round_up(nc, _SUBLANES))
        n_tiles = pl.cdiv(nc, nc_tile)
        ncores = _NUM_CORES if n_tiles >= 2 else 1
        steps = pl.cdiv(n_tiles, ncores)
        needs_row_mask = (ncores * steps * nc_tile != nc)
        needs_ent_mask = needs_row_mask or (hw_p != hw)

        def img_map(cc, t, s=steps, nb=n_tiles):
            return (jnp.minimum(cc * s + t, nb - 1), 0)

        kernel = functools.partial(
            _reg_kernel, eps=eps, h=h, w=w, hw=hw, nc=nc, nc_tile=nc_tile,
            needs_row_mask=needs_row_mask, needs_ent_mask=needs_ent_mask)

        sem0 = pltpu.CORE_PARALLEL if ncores > 1 else pltpu.ARBITRARY
        parts = pl.pallas_call(
            kernel,
            out_shape=jax.ShapeDtypeStruct((ncores, 3, _SUBLANES, _LANES),
                                           jnp.float32),
            grid_spec=pltpu.PrefetchScalarGridSpec(
                num_scalar_prefetch=0,
                grid=(ncores, steps),
                in_specs=[
                    pl.BlockSpec(memory_space=pltpu.MemorySpace.SMEM),   # inv_sums
                    pl.BlockSpec((1, hw_p), lambda cc, t: (0, 0)),       # dw_keep
                    pl.BlockSpec((nc_tile, hw_p), img_map),              # phase
                    pl.BlockSpec((nc_tile, hw_p), img_map),              # attenuation
                ],
                out_specs=pl.BlockSpec((1, 3, _SUBLANES, _LANES),
                                       lambda cc, t: (cc, 0, 0, 0)),
            ),
            compiler_params=pltpu.CompilerParams(
                dimension_semantics=(sem0, pltpu.ARBITRARY),
                vmem_limit_bytes=_VMEM_LIMIT),
        )(inv_sums, dw_keep, ph2, at2)

        sums3 = parts.sum(axis=(0, 2, 3))
        tv1, tv2, entropy = sums3[0], sums3[1], sums3[2]

        reg = self.reg_entropy_loss * entropy
        if self.reg_l1_ratio != 0.0:
            # reg_l1_ratio * compute_total_variation_loss(r, reg_l1_ratio) = ratio^2 * TV1
            reg = reg + self.reg_l1_ratio * self.reg_l1_ratio * tv1
        if self.reg_l2_ratio != 0.0:
            reg = reg + self.reg_l2_ratio * self.reg_l2_ratio * tv2
        return reg

    # ------------------------------ forward ------------------------------
    def __call__(self, phase, attenuation, propagated_intensity, transformed_images,
                 target=None, pred=None, initial_pred=None):
        if initial_pred is not None:
            # TODO(synk): single-image regularization path (softplus(img) TV +
            # entropy) for initial_pred is not wired up.
            raise NotImplementedError("initial_pred regularization path not supported")

        need_reg = (self.reg_entropy_loss != 0.0 or self.reg_l1_ratio != 0.0
                    or self.reg_l2_ratio != 0.0)
        has_pair2 = pred is not None and target is not None
        size0 = int(propagated_intensity.size)

        # Fuse every first-pass reduction that streams the same element count into
        # one pallas_call (one grid, one DMA window per input).
        fuse_pair2 = has_pair2 and int(pred.size) == size0
        fuse_reg = need_reg and int(phase.size) == size0

        arrays = [transformed_images, propagated_intensity]
        n_pairs = 1
        if fuse_pair2:
            arrays += [target, pred]
            n_pairs += 1
        if fuse_reg:
            arrays += [phase, attenuation]
        n_sums = 2 if fuse_reg else 0
        nq = 2 * n_pairs + n_sums
        sums = _lane_dense_reduce(arrays, _pair_sum_quants(n_pairs, n_sums), nq)

        loss = (self.l1_ratio * sums[0] + self.l2_ratio * sums[1]) / size0
        pos = 2
        if has_pair2:
            if fuse_pair2:
                s_abs, s_sq = sums[pos], sums[pos + 1]
                pos += 2
            else:
                s2 = _lane_dense_reduce([target, pred], _pair_sum_quants(1, 0), 2)
                s_abs, s_sq = s2[0], s2[1]
            loss = loss + (self.l1_ratio * s_abs + self.l2_ratio * s_sq) / int(pred.size)
        if need_reg:
            if fuse_reg:
                ph_at_sums = sums[pos:pos + 2]
            else:
                ph_at_sums = _lane_dense_reduce([phase, attenuation],
                                                _pair_sum_quants(0, 2), 2)
            loss = loss + self._regularization_list(phase, attenuation, ph_at_sums)
        return loss


if __name__ == "__main__":
    key = jax.random.PRNGKey(0)
    k1, k2, k3, k4 = jax.random.split(key, 4)
    N, C, H, W = 2, 4, 16, 16
    phase = jax.random.normal(k1, (N, C, H, W), jnp.float32)
    attenuation = jax.random.normal(k2, (N, C, H, W), jnp.float32)
    propagated_intensity = jax.random.uniform(k3, (N, C, H, W), jnp.float32)
    transformed_images = jax.random.uniform(k4, (N, C, H, W), jnp.float32)

    L1, L2 = 1.0, 0.5
    RL1, RL2, RENT = 0.01, 0.001, 0.0001

    loss_mod = GeneratorLossPallas(
        output_num=2,
        l1_ratio=L1, l2_ratio=L2,
        reg_l1_ratio=RL1, reg_l2_ratio=RL2, reg_entropy_loss=RENT,
    )
    loss = jax.block_until_ready(
        loss_mod(phase, attenuation, propagated_intensity, transformed_images))

    # Pure-JAX reference (mirrors the PyTorch semantics).
    d = transformed_images - propagated_intensity
    fid_ref = L1 * jnp.mean(jnp.abs(d)) + L2 * jnp.mean(d * d)
    r = _softplus(-phase) / _softplus(attenuation)
    dh = r[:, :, 1:, :] - r[:, :, :-1, :]
    dwv = r[:, :, :, 1:] - r[:, :, :, :-1]
    tv1_ref = jnp.sum(jnp.abs(dh)) + jnp.sum(jnp.abs(dwv))
    tv2_ref = jnp.sum(dh * dh) + jnp.sum(dwv * dwv)
    eps = 1e-8

    def _ent(img):
        p = jnp.clip(img / (jnp.sum(img) + eps), eps, 1.0 - eps)
        return -jnp.sum(p * jnp.log(p))

    ref = (fid_ref + RL1 * RL1 * tv1_ref + RL2 * RL2 * tv2_ref
           + RENT * (_ent(phase) + _ent(attenuation)))

    assert jnp.allclose(loss, ref, rtol=1e-3, atol=1e-5), (float(loss), float(ref))
    print("KERNEL_OK")
</pallas_src>

<mosaic_0001>
module attributes {stable_mosaic.version = 11 : i64} {
  func.func @kernel(%arg0: i32, %arg1: i32, %arg2: memref<16x128xf32, #tpu.memory_space<vmem>>, %arg3: memref<16x128xf32, #tpu.memory_space<vmem>>, %arg4: memref<16x128xf32, #tpu.memory_space<vmem>>, %arg5: memref<16x128xf32, #tpu.memory_space<vmem>>, %arg6: memref<1x4x8x128xf32, #tpu.memory_space<vmem>>) attributes {dimension_semantics = [#tpu.dimension_semantics<arbitrary>, #tpu.dimension_semantics<arbitrary>], iteration_bounds = array<i64: 1, 1>, scalar_prefetch = 0 : i64, scratch_operands = 0 : i64, tpu.core_type = #tpu.core_type<tc>, window_params = [{transform_indices = @transform_0, window_bounds = array<i64: 16, 128>}, {transform_indices = @transform_1, window_bounds = array<i64: 16, 128>}, {transform_indices = @transform_2, window_bounds = array<i64: 16, 128>}, {transform_indices = @transform_3, window_bounds = array<i64: 16, 128>}, {transform_indices = @transform_4, window_bounds = array<i64: 1, 4, 8, 128>}]} {
    %c0_i32 = arith.constant 0 : i32
    %0 = arith.cmpi eq, %arg1, %c0_i32 : i32
    %1 = arith.extui %0 : i1 to i32
    %c0_i32_0 = arith.constant 0 : i32
    %2 = arith.cmpi ne, %1, %c0_i32_0 : i32
    scf.if %2 {
      %cst_40 = arith.constant 0.000000e+00 : f32
      %42 = vector.broadcast %cst_40 : f32 to vector<1x4x8x128xf32>
      %c0_41 = arith.constant 0 : index
      %c0_42 = arith.constant 0 : index
      %c0_43 = arith.constant 0 : index
      %c0_44 = arith.constant 0 : index
      %43 = vector.load %arg6[%c0_41, %c0_42, %c0_43, %c0_44] : memref<1x4x8x128xf32, #tpu.memory_space<vmem>>, vector<1x4x8x128xf32>
      tpu.vector_store %arg6[%c0_41, %c0_42, %c0_43, %c0_44], %42 {strides = array<i32>} : memref<1x4x8x128xf32, #tpu.memory_space<vmem>>, vector<1x4x8x128xf32>,
    } else {
    }
    %c0 = arith.constant 0 : index
    %c0_1 = arith.constant 0 : index
    %3 = vector.load %arg2[%c0, %c0_1] : memref<16x128xf32, #tpu.memory_space<vmem>>, vector<16x128xf32>
    %c0_2 = arith.constant 0 : index
    %c0_3 = arith.constant 0 : index
    %4 = vector.load %arg3[%c0_2, %c0_3] : memref<16x128xf32, #tpu.memory_space<vmem>>, vector<16x128xf32>
    %c0_4 = arith.constant 0 : index
    %c0_5 = arith.constant 0 : index
    %5 = vector.load %arg4[%c0_4, %c0_5] : memref<16x128xf32, #tpu.memory_space<vmem>>, vector<16x128xf32>
    %c0_6 = arith.constant 0 : index
    %c0_7 = arith.constant 0 : index
    %6 = vector.load %arg5[%c0_6, %c0_7] : memref<16x128xf32, #tpu.memory_space<vmem>>, vector<16x128xf32>
    %7 = arith.subf %3, %4 : vector<16x128xf32>
    %8 = math.absf %7 : vector<16x128xf32>
    %9 = arith.mulf %7, %7 : vector<16x128xf32>
    %c0_8 = arith.constant 0 : index
    %c0_9 = arith.constant 0 : index
    %c0_10 = arith.constant 0 : index
    %c0_11 = arith.constant 0 : index
    %10 = vector.load %arg6[%c0_8, %c0_9, %c0_10, %c0_11] : memref<1x4x8x128xf32, #tpu.memory_space<vmem>>, vector<1x1x8x128xf32>
    %11 = vector.shape_cast %10 : vector<1x1x8x128xf32> to vector<8x128xf32>
    %12 = vector.shape_cast %8 : vector<16x128xf32> to vector<2x8x128xf32>
    %cst = arith.constant dense<0.000000e+00> : vector<8x128xf32>
    %13 = vector.multi_reduction <add>, %12, %cst [0] : vector<2x8x128xf32> to vector<8x128xf32>
    %14 = arith.addf %11, %13 : vector<8x128xf32>
    %c0_12 = arith.constant 0 : index
    %c0_13 = arith.constant 0 : index
    %c0_14 = arith.constant 0 : index
    %c0_15 = arith.constant 0 : index
    %15 = vector.load %arg6[%c0_12, %c0_13, %c0_14, %c0_15] : memref<1x4x8x128xf32, #tpu.memory_space<vmem>>, vector<1x1x8x128xf32>
    %16 = vector.shape_cast %15 : vector<1x1x8x128xf32> to vector<8x128xf32>
    %17 = vector.shape_cast %14 : vector<8x128xf32> to vector<1x1x8x128xf32>
    tpu.vector_store %arg6[%c0_12, %c0_13, %c0_14, %c0_15], %17 {strides = array<i32>} : memref<1x4x8x128xf32, #tpu.memory_space<vmem>>, vector<1x1x8x128xf32>,
    %c0_16 = arith.constant 0 : index
    %c1 = arith.constant 1 : index
    %c0_17 = arith.constant 0 : index
    %c0_18 = arith.constant 0 : index
    %18 = vector.load %arg6[%c0_16, %c1, %c0_17, %c0_18] : memref<1x4x8x128xf32, #tpu.memory_space<vmem>>, vector<1x1x8x128xf32>
    %19 = vector.shape_cast %18 : vector<1x1x8x128xf32> to vector<8x128xf32>
    %20 = vector.shape_cast %9 : vector<16x128xf32> to vector<2x8x128xf32>
    %cst_19 = arith.constant dense<0.000000e+00> : vector<8x128xf32>
    %21 = vector.multi_reduction <add>, %20, %cst_19 [0] : vector<2x8x128xf32> to vector<8x128xf32>
    %22 = arith.addf %19, %21 : vector<8x128xf32>
    %c0_20 = arith.constant 0 : index
    %c1_21 = arith.constant 1 : index
    %c0_22 = arith.constant 0 : index
    %c0_23 = arith.constant 0 : index
    %23 = vector.load %arg6[%c0_20, %c1_21, %c0_22, %c0_23] : memref<1x4x8x128xf32, #tpu.memory_space<vmem>>, vector<1x1x8x128xf32>
    %24 = vector.shape_cast %23 : vector<1x1x8x128xf32> to vector<8x128xf32>
    %25 = vector.shape_cast %22 : vector<8x128xf32> to vector<1x1x8x128xf32>
    tpu.vector_store %arg6[%c0_20, %c1_21, %c0_22, %c0_23], %25 {strides = array<i32>} : memref<1x4x8x128xf32, #tpu.memory_space<vmem>>, vector<1x1x8x128xf32>,
    %c0_24 = arith.constant 0 : index
    %c2 = arith.constant 2 : index
    %c0_25 = arith.constant 0 : index
    %c0_26 = arith.constant 0 : index
    %26 = vector.load %arg6[%c0_24, %c2, %c0_25, %c0_26] : memref<1x4x8x128xf32, #tpu.memory_space<vmem>>, vector<1x1x8x128xf32>
    %27 = vector.shape_cast %26 : vector<1x1x8x128xf32> to vector<8x128xf32>
    %28 = vector.shape_cast %5 : vector<16x128xf32> to vector<2x8x128xf32>
    %cst_27 = arith.constant dense<0.000000e+00> : vector<8x128xf32>
    %29 = vector.multi_reduction <add>, %28, %cst_27 [0] : vector<2x8x128xf32> to vector<8x128xf32>
    %30 = arith.addf %27, %29 : vector<8x128xf32>
    %c0_28 = arith.constant 0 : index
    %c2_29 = arith.constant 2 : index
    %c0_30 = arith.constant 0 : index
    %c0_31 = arith.constant 0 : index
    %31 = vector.load %arg6[%c0_28, %c2_29, %c0_30, %c0_31] : memref<1x4x8x128xf32, #tpu.memory_space<vmem>>, vector<1x1x8x128xf32>
    %32 = vector.shape_cast %31 : vector<1x1x8x128xf32> to vector<8x128xf32>
    %33 = vector.shape_cast %30 : vector<8x128xf32> to vector<1x1x8x128xf32>
    tpu.vector_store %arg6[%c0_28, %c2_29, %c0_30, %c0_31], %33 {strides = array<i32>} : memref<1x4x8x128xf32, #tpu.memory_space<vmem>>, vector<1x1x8x128xf32>,
    %c0_32 = arith.constant 0 : index
    %c3 = arith.constant 3 : index
    %c0_33 = arith.constant 0 : index
    %c0_34 = arith.constant 0 : index
    %34 = vector.load %arg6[%c0_32, %c3, %c0_33, %c0_34] : memref<1x4x8x128xf32, #tpu.memory_space<vmem>>, vector<1x1x8x128xf32>
    %35 = vector.shape_cast %34 : vector<1x1x8x128xf32> to vector<8x128xf32>
    %36 = vector.shape_cast %6 : vector<16x128xf32> to vector<2x8x128xf32>
    %cst_35 = arith.constant dense<0.000000e+00> : vector<8x128xf32>
    %37 = vector.multi_reduction <add>, %36, %cst_35 [0] : vector<2x8x128xf32> to vector<8x128xf32>
    %38 = arith.addf %35, %37 : vector<8x128xf32>
    %c0_36 = arith.constant 0 : index
    %c3_37 = arith.constant 3 : index
    %c0_38 = arith.constant 0 : index
    %c0_39 = arith.constant 0 : index
    %39 = vector.load %arg6[%c0_36, %c3_37, %c0_38, %c0_39] : memref<1x4x8x128xf32, #tpu.memory_space<vmem>>, vector<1x1x8x128xf32>
    %40 = vector.shape_cast %39 : vector<1x1x8x128xf32> to vector<8x128xf32>
    %41 = vector.shape_cast %38 : vector<8x128xf32> to vector<1x1x8x128xf32>
    tpu.vector_store %arg6[%c0_36, %c3_37, %c0_38, %c0_39], %41 {strides = array<i32>} : memref<1x4x8x128xf32, #tpu.memory_space<vmem>>, vector<1x1x8x128xf32>,
    return
  }
  func.func @transform_0(%arg0: i32, %arg1: i32) -> (i32, i32) {
    %c1_i32 = arith.constant 1 : i32
    %0 = arith.muli %arg0, %c1_i32 : i32
    %1 = arith.addi %0, %arg1 : i32
    %c0_i32 = arith.constant 0 : i32
    %2 = arith.minsi %1, %c0_i32 : i32
    %c0_i32_0 = arith.constant 0 : i32
    %c0_i32_1 = arith.constant 0 : i32
    return %2, %c0_i32_0 : i32, i32
  }
  func.func @transform_1(%arg0: i32, %arg1: i32) -> (i32, i32) {
    %c1_i32 = arith.constant 1 : i32
    %0 = arith.muli %arg0, %c1_i32 : i32
    %1 = arith.addi %0, %arg1 : i32
    %c0_i32 = arith.constant 0 : i32
    %2 = arith.minsi %1, %c0_i32 : i32
    %c0_i32_0 = arith.constant 0 : i32
    %c0_i32_1 = arith.constant 0 : i32
    return %2, %c0_i32_0 : i32, i32
  }
  func.func @transform_2(%arg0: i32, %arg1: i32) -> (i32, i32) {
    %c1_i32 = arith.constant 1 : i32
    %0 = arith.muli %arg0, %c1_i32 : i32
    %1 = arith.addi %0, %arg1 : i32
    %c0_i32 = arith.constant 0 : i32
    %2 = arith.minsi %1, %c0_i32 : i32
    %c0_i32_0 = arith.constant 0 : i32
    %c0_i32_1 = arith.constant 0 : i32
    return %2, %c0_i32_0 : i32, i32
  }
  func.func @transform_3(%arg0: i32, %arg1: i32) -> (i32, i32) {
    %c1_i32 = arith.constant 1 : i32
    %0 = arith.muli %arg0, %c1_i32 : i32
    %1 = arith.addi %0, %arg1 : i32
    %c0_i32 = arith.constant 0 : i32
    %2 = arith.minsi %1, %c0_i32 : i32
    %c0_i32_0 = arith.constant 0 : i32
    %c0_i32_1 = arith.constant 0 : i32
    return %2, %c0_i32_0 : i32, i32
  }
  func.func @transform_4(%arg0: i32, %arg1: i32) -> (i32, i32, i32, i32) {
    %c0_i32 = arith.constant 0 : i32
    %c0_i32_0 = arith.constant 0 : i32
    %c0_i32_1 = arith.constant 0 : i32
    %c0_i32_2 = arith.constant 0 : i32
    return %arg0, %c0_i32, %c0_i32_0, %c0_i32_1 : i32, i32, i32, i32
  }
}

</mosaic_0001>

<bundles_post_ra>
// kernel: tpu_custom_call.1
= control target key start
LH: loop header
LB: loop body
LE: loop exit
PB: predicated region body
PF: predicated region fallthrough
CT: control target
= control target key end

     0   :  { %9 = vsyncpa [#allocation3], 0  ;;  %s428_s0 = inlined_call_operand.hbm [shape: f32[16,128], index: 0, kind: input, shape index: {}]   ;;  %s429_s1 = inlined_call_operand.hbm [shape: f32[16,128], index: 1, kind: input, shape index: {}]   ;;  %s430_s2 = inlined_call_operand.hbm [shape: f32[16,128], index: 2, kind: input, shape index: {}]   ;;  %s431_s3 = inlined_call_operand.hbm [shape: f32[16,128], index: 3, kind: input, shape index: {}]   ;;  %s432_s4 = inlined_call_operand.hbm [shape: f32[1,4,8,128], index: 4, kind: output, shape index: {}]  }
   0x1   :  { %10 = vsyncpa [#allocation6], 0 }
   0x2   :  { %11 = vsyncpa [#allocation9], 0 }
   0x3   :  { %12 = vsyncpa [#allocation4], 0  ;;  %s307_s15 = smov [#allocation5]   ;;  %s308_s17 = smov [#allocation2]  }
   0x4   :  { %s42_s16 = sshll.u32 %s307_s15, 4  ;;  %s24_s18 = sshll.u32 %s308_s17, 4  ;;  %s43_s16 = int_to_ptr.vmem [resolvable:$true] %s42_s16  ;;  %s339_s18 = int_to_ptr.vmem [resolvable:$true] %s24_s18 }
   0x5   :  { %s189_s21 = scalar_lea.hbm %s429_s1, 256 }
   0x6   :  { %p190_p0 = scmp.ne.s32.totalorder %s429_s1, %s189_s21  ;;  %p193_p1 = scmp.lt.u32.totalorder %s189_s21, %s429_s1 }
   0x8   :  { %p195_p2 = pnand %p193_p1, %p190_p0 }
   0xa   :  { %198 = shalt.err (!%p195_p2)
}
   0xb   :  { %s199_s26 = scalar_lea.vmem %s43_s16, 256  ;;  %p204_p4 = scmp.lt.s32.totalorder %s43_s16, %s43_s16 }
   0xc   :  { %p200_p3 = scmp.ne.s32.totalorder %s43_s16, %s199_s26  ;;  %p205_p5 = scmp.lt.s32.totalorder %s199_s26, %s199_s26 }
   0xe   :  { %p206_p6 = por %p205_p5, %p204_p4 }
  0x10   :  { %p207_p7 = pnand %p206_p6, %p200_p3 }
  0x12   :  { %210 = shalt.err (!%p207_p7)
}
  0x13   :  { %s309_s27 = smov 128   ;;  %s310_s28 = smov 8  }
  0x14   :  { %48 = dma.hbm_to_vmem [thread:$0]  %s429_s1, 256, %s43_s16, [#allocation6], %s309_s27, %s309_s27, %s310_s28  }
  0x15   :  { %s211_s7 = scalar_lea.hbm %s428_s0, 256 }
  0x16   :  { %p212_p8 = scmp.ne.s32.totalorder %s428_s0, %s211_s7  ;;  %p215_p9 = scmp.lt.u32.totalorder %s211_s7, %s428_s0 }
  0x18   :  { %p217_p10 = pnand %p215_p9, %p212_p8 }
  0x1a   :  { %220 = shalt.err (!%p217_p10)
}
  0x1b   :  { %s221_s12 = scalar_lea.vmem %s339_s18, 256  ;;  %p226_p12 = scmp.lt.s32.totalorder %s339_s18, %s339_s18 }
  0x1c   :  { %p222_p11 = scmp.ne.s32.totalorder %s339_s18, %s221_s12  ;;  %p227_p13 = scmp.lt.s32.totalorder %s221_s12, %s221_s12 }
  0x1e   :  { %p228_p0 = por %p227_p13, %p226_p12 }
  0x20   :  { %p229_p1 = pnand %p228_p0, %p222_p11 }
  0x22   :  { %232 = shalt.err (!%p229_p1)
}
  0x23   :  { %30 = dma.hbm_to_vmem [thread:$0]  %s428_s0, 256, %s339_s18, [#allocation3], %s309_s27, %s309_s27, %s310_s28  }
  0x24   :  { %s311_s14 = smov [#allocation7]   ;;  %s312_s16 = smov [#allocation8]  }
  0x25   :  { %s60_s15 = sshll.u32 %s311_s14, 4  ;;  %s78_s17 = sshll.u32 %s312_s16, 4  ;;  %s61_s15 = int_to_ptr.vmem [resolvable:$true] %s60_s15  ;;  %s376_s17 = int_to_ptr.vmem [resolvable:$true] %s78_s17 }
  0x26   :  { %s233_s21 = scalar_lea.hbm %s430_s2, 256 }
  0x27   :  { %p234_p2 = scmp.ne.s32.totalorder %s430_s2, %s233_s21  ;;  %p237_p3 = scmp.lt.u32.totalorder %s233_s21, %s430_s2 }
  0x29   :  { %p239_p4 = pnand %p237_p3, %p234_p2 }
  0x2b   :  { %242 = shalt.err (!%p239_p4)
}
  0x2c   :  { %s243_s0 = scalar_lea.vmem %s61_s15, 256  ;;  %p248_p6 = scmp.lt.s32.totalorder %s61_s15, %s61_s15 }
  0x2d   :  { %p244_p5 = scmp.ne.s32.totalorder %s61_s15, %s243_s0  ;;  %p249_p7 = scmp.lt.s32.totalorder %s243_s0, %s243_s0 }
  0x2f   :  { %p250_p8 = por %p249_p7, %p248_p6 }
  0x31   :  { %p251_p9 = pnand %p250_p8, %p244_p5 }
  0x33   :  { %254 = shalt.err (!%p251_p9)
}
  0x34   :  { %66 = dma.hbm_to_vmem [thread:$0]  %s430_s2, 256, %s61_s15, [#allocation6], %s309_s27, %s309_s27, %s310_s28  }
  0x35   :  { %s255_s5 = scalar_lea.hbm %s431_s3, 256 }
  0x36   :  { %p256_p10 = scmp.ne.s32.totalorder %s431_s3, %s255_s5  ;;  %p259_p11 = scmp.lt.u32.totalorder %s255_s5, %s431_s3 }
  0x38   :  { %p261_p12 = pnand %p259_p11, %p256_p10 }
  0x3a   :  { %264 = shalt.err (!%p261_p12)
}
  0x3b   :  { %s265_s10 = scalar_lea.vmem %s376_s17, 256  ;;  %p270_p0 = scmp.lt.s32.totalorder %s376_s17, %s376_s17 }
  0x3c   :  { %p266_p13 = scmp.ne.s32.totalorder %s376_s17, %s265_s10  ;;  %p271_p1 = scmp.lt.s32.totalorder %s265_s10, %s265_s10 }
  0x3e   :  { %p272_p2 = por %p271_p1, %p270_p0 }
  0x40   :  { %p273_p3 = pnand %p272_p2, %p266_p13 }
  0x42   :  { %276 = shalt.err (!%p273_p3)
}
  0x43   :  { %84 = dma.hbm_to_vmem [thread:$0]  %s431_s3, 256, %s376_s17, [#allocation9], %s309_s27, %s309_s27, %s310_s28  }
  0x44   :  { %299 = dma.done.wait [#allocation3], 256  }
  0x45   :  { %300 = vsyncadd [#allocation3], 4294967040 }
  0x46   :  { %301 = dma.done.wait [#allocation6], 512  }
  0x47   :  { %302 = vsyncadd [#allocation6], 4294966784 }
  0x48   :  { %303 = dma.done.wait [#allocation9], 256  }
  0x49   :  { %304 = vsyncadd [#allocation9], 4294967040  ;;  %v121_v0 = vld [vmem:[#allocation2] sm:$0xff]  ;;  %v122_v1 = vld [vmem:[#allocation2 + $0x8] sm:$0xff]  ;;  %s313_s3 = smov [#allocation10]  }
  0x4a   :  { %v123_v2 = vld [vmem:[#allocation5] sm:$0xff]  ;;  %v124_v3 = vld [vmem:[#allocation5 + $0x8] sm:$0xff]  ;;  %v125_v5 = vld [vmem:[#allocation7] sm:$0xff]  ;;  %s159_s12 = sshll.u32 %s313_s3, 4  ;;  %s160_s12 = int_to_ptr.vmem [resolvable:$true] %s159_s12 }
  0x4b   :  { %v129_v4 = vsub.f32 %v121_v0, %v123_v2  ;;  %v126_v6 = vld [vmem:[#allocation7 + $0x8] sm:$0xff]  ;;  %v130_v7 = vsub.f32 %v122_v1, %v124_v3  ;;  %v127_v9 = vld [vmem:[#allocation8] sm:$0xff]  ;;  %v128_v10 = vld [vmem:[#allocation8 + $0x8] sm:$0xff]  ;;  %s277_s1 = scalar_lea.vmem %s160_s12, 512  ;;  %p282_p5 = scmp.lt.s32.totalorder %s160_s12, %s160_s12 }
  0x4c   :  { %v146_v8 = vadd.f32 %v126_v6, %v125_v5  ;;  %v151_v13 = vadd.f32 %v128_v10, %v127_v9  ;;  %p278_p4 = scmp.ne.s32.totalorder %s160_s12, %s277_s1  ;;  %p283_p6 = scmp.lt.s32.totalorder %s277_s1, %s277_s1 }
  0x4d   :  { %v131_v11 = vand.u32 2147483647, %v129_v4  ;;  %v133_v12 = vmul.f32 %v129_v4, %v129_v4  ;;  %v132_v14 = vand.u32 2147483647, %v130_v7  ;;  %v134_v15 = vmul.f32 %v130_v7, %v130_v7 }
  0x4e   :  { %148 = vst [vmem:[#allocation10 + $0x10] sm:$0xff] %v146_v8  ;;  %153 = vst [vmem:[#allocation10 + $0x18] sm:$0xff] %v151_v13  ;;  %p284_p7 = por %p283_p6, %p282_p5 }
  0x4f   :  { %v136_v16 = vadd.f32 %v132_v14, %v131_v11  ;;  %v141_v17 = vadd.f32 %v134_v15, %v133_v12 }
  0x50   :  { %p285_p8 = pnand %p284_p7, %p278_p4 }
  0x51   :  { %138 = vst [vmem:[#allocation10] sm:$0xff] %v136_v16  ;;  %143 = vst [vmem:[#allocation10 + $0x8] sm:$0xff] %v141_v17 }
  0x52   :  { %288 = shalt.err (!%p285_p8)
}
  0x53   :  { %s289_s15 = scalar_lea.hbm %s432_s4, 512 }
  0x54   :  { %p290_p9 = scmp.ne.s32.totalorder %s432_s4, %s289_s15  ;;  %p293_p10 = scmp.lt.u32.totalorder %s289_s15, %s432_s4 }
  0x56   :  { %p295_p11 = pnand %p293_p10, %p290_p9 }
  0x58   :  { %298 = shalt.err (!%p295_p11)
}
  0x59   :  { %165 = dma.vmem_to_hbm [thread:$0]  %s160_s12, 512, %s432_s4, [#allocation4], %s309_s27, %s309_s27, %s310_s28  }
  0x5a   :  { %305 = dma.done.wait [#allocation4], 512  }
  0x5b   :  { %306 = vsyncadd [#allocation4], 4294966784 }
  0x5c   :  { %169 = vsyncpa [#allocation3], 1 }
  0x5d   :  { %170 = vsyncpa [#allocation6], 1 }
  0x5e   :  { %171 = vsyncpa [#allocation9], 1 }
  0x5f   :  { %172 = vsyncpa [#allocation4], 1 }

</bundles_post_ra>
